<compile_context>
chip_gen: v7x
topology: tpu7x:2x2x1
jax: 0.10.0
libtpu: 0.0.40
codegen_flags: <defaults>
</compile_context>

<pallas_src>
import jax
import jax.numpy as jnp
from jax.experimental import pallas as pl
from jax.experimental.pallas import tpu as pltpu


def _make_psa_kernel(T, C, n_taps, dilation):
    """Fused PSA kernel body; one grid step == one batch element.

    Refs:
      xpad_ref : (Tp, Cin)          activation (channels-last, shared max padding), bf16
      w_ref    : (n_taps, Cin, 4C)  tap-stacked conv weights, cols [conv4|conv3|conv2|conv1]
      fc1w_ref : (C, Cr)   fc1b_ref : (1, Cr)
      fc2w_ref : (Cr, C)   fc2b_ref : (1, C)
      out_ref  : (T, 4C)
      acc_ref  : (T, 4C) f32 scratch (fused conv accumulator)
    """
    C4 = 4 * C

    def kernel(xpad_ref, w_ref, fc1w_ref, fc1b_ref, fc2w_ref, fc2b_ref,
               out_ref, acc_ref):
        # ---- fused 4-branch dilated conv: n_taps matmuls into one accumulator ----
        # Tap 0 initializes the accumulator (no zero-init + add).
        acc_ref[...] = jnp.dot(xpad_ref[pl.ds(0, T), :], w_ref[0],
                               preferred_element_type=jnp.float32)
        for j in range(1, n_taps):                      # static unroll, n_taps <= 7
            xs = xpad_ref[pl.ds(j * dilation, T), :]    # time-shifted slab
            acc_ref[...] += jnp.dot(xs, w_ref[j],
                                    preferred_element_type=jnp.float32)

        y = acc_ref[...]                                 # (T, 4C) f32, cols [b4|b3|b2|b1]

        # ---- SE gates for all 4 branches, batched into one matmul chain ----
        m = jnp.sum(y, axis=0, keepdims=True) * (1.0 / T)            # global mean over T, (1, 4C)
        mm = jnp.concatenate([m[:, i * C:(i + 1) * C] for i in range(4)],
                             axis=0)                                  # (4, C): [m4, m3, m2, m1]
        h = jnp.dot(mm, fc1w_ref[...], preferred_element_type=jnp.float32) + fc1b_ref[...]
        h = jnp.maximum(h, 0.0)                                       # ReLU
        s = jnp.dot(h, fc2w_ref[...], preferred_element_type=jnp.float32) + fc2b_ref[...]
        s = jax.nn.sigmoid(s)                                         # (4, C)

        # ---- softmax over the 4 branches (rows) per channel ----
        e = jnp.exp(s - jnp.max(s, axis=0, keepdims=True))
        a = e * pl.reciprocal(jnp.sum(e, axis=0, keepdims=True), approx=True)   # (4, C)

        # ---- apply attention; channel order already matches the module output ----
        scale = jnp.concatenate([a[i:i + 1, :] for i in range(4)], axis=-1)      # (1, 4C)
        out_ref[...] = (y * scale).astype(out_ref.dtype)

    return kernel


def psa_forward(x, params, dilation, conv_kernels=(1, 3, 5, 7),
                compute_dtype=jnp.bfloat16):
    """x: (B, inplans, T) in PyTorch NCL layout. Returns (B, planes, T) in x.dtype."""
    B, Cin, T = x.shape
    w_convs = [params[f"conv_{i + 1}"] for i in range(4)]    # each (C, Cin, k_i)
    C = w_convs[0].shape[0]
    C4 = 4 * C
    fc1_w, fc1_b = params["fc1_w"], params["fc1_b"]          # (Cr, C, 1), (Cr,)
    fc2_w, fc2_b = params["fc2_w"], params["fc2_b"]          # (C, Cr, 1), (C,)
    Cr = fc1_w.shape[0]

    Kmax = max(conv_kernels)
    pad_max = (Kmax // 2) * dilation
    Tp = T + 2 * pad_max

    # ---- glue: channels-last activation with a single shared max padding ----
    # TODO(synk): fold the NCL->NTC transpose + pad into the pipeline (halo via index_map)
    #             to remove these wrapper-side HBM round trips on mem-bound shapes.
    x_tc = jnp.transpose(x, (0, 2, 1)).astype(compute_dtype)    # (B, T, Cin)
    xpad = jnp.pad(x_tc, ((0, 0), (pad_max, pad_max), (0, 0)))  # (B, Tp, Cin)

    # ---- glue: tap-stacked fused conv weight (Kmax, Cin, 4C), cols [conv4|conv3|conv2|conv1] ----
    w_kio = [jnp.transpose(w, (2, 1, 0)).astype(compute_dtype) for w in w_convs]  # (k, Cin, C)
    branch_order = (3, 2, 1, 0)        # output channel order = conv_4, conv_3, conv_2, conv_1
    taps = []
    for j in range(Kmax):
        cols = []
        for bi in branch_order:
            k = conv_kernels[bi]
            lo = (Kmax - k) // 2       # centered tap offset inside the Kmax-tap frame
            if lo <= j < lo + k:
                cols.append(w_kio[bi][j - lo])
            else:
                cols.append(jnp.zeros((Cin, C), compute_dtype))
        taps.append(jnp.concatenate(cols, axis=-1))              # (Cin, 4C)
    w_stacked = jnp.stack(taps, axis=0)                          # (Kmax, Cin, 4C)

    fc1w = jnp.transpose(fc1_w[:, :, 0], (1, 0)).astype(jnp.float32)   # (C, Cr)
    fc2w = jnp.transpose(fc2_w[:, :, 0], (1, 0)).astype(jnp.float32)   # (Cr, C)
    fc1b = fc1_b[None, :].astype(jnp.float32)                          # (1, Cr)
    fc2b = fc2_b[None, :].astype(jnp.float32)                          # (1, C)

    out_dtype = x.dtype
    in_bpe = jnp.dtype(compute_dtype).itemsize
    out_bpe = jnp.dtype(out_dtype).itemsize

    # Per-step VMEM budget: double-buffered activation/output tiles + resident weights + scratch.
    vmem_need = (2 * Tp * Cin * in_bpe          # xpad tile (double-buffered)
                 + 2 * T * C4 * out_bpe         # output tile (double-buffered)
                 + Kmax * Cin * C4 * in_bpe     # stacked conv weights (resident)
                 + T * C4 * 4                   # f32 accumulator scratch
                 + (C * Cr + Cr * C + Cr + C) * 4)
    vmem_limit = int(min(max(2 * vmem_need, 32 * 2 ** 20), 64 * 2 ** 20))

    kernel = _make_psa_kernel(T, C, Kmax, dilation)

    # TODO(synk): for very long T with small B, add a T grid axis with a cross-tile sum
    #             accumulator (two-pass SE) instead of the full-T tile used here.
    out_tc = pl.pallas_call(
        kernel,
        out_shape=jax.ShapeDtypeStruct((B, T, C4), out_dtype),
        grid=(B,),
        in_specs=[
            pl.BlockSpec((None, Tp, Cin), lambda b: (b, 0, 0)),     # activation: one batch elem/step
            pl.BlockSpec((Kmax, Cin, C4), lambda b: (0, 0, 0)),     # stacked conv weights (resident)
            pl.BlockSpec((C, Cr), lambda b: (0, 0)),                # fc1 weight
            pl.BlockSpec((1, Cr), lambda b: (0, 0)),                # fc1 bias
            pl.BlockSpec((Cr, C), lambda b: (0, 0)),                # fc2 weight
            pl.BlockSpec((1, C), lambda b: (0, 0)),                 # fc2 bias
        ],
        out_specs=pl.BlockSpec((None, T, C4), lambda b: (b, 0, 0)),
        scratch_shapes=[pltpu.VMEM((T, C4), jnp.float32)],
        compiler_params=pltpu.CompilerParams(
            dimension_semantics=("parallel",),
            vmem_limit_bytes=vmem_limit),
    )(xpad, w_stacked, fc1w, fc1b, fc2w, fc2b)

    return jnp.transpose(out_tc, (0, 2, 1))                          # (B, 4*C, T)


def psa_reference(x, params, dilation, conv_kernels=(1, 3, 5, 7)):
    """Pure-JAX reference matching the PyTorch forward, for validation."""
    def conv1d(xx, w, pad):
        return jax.lax.conv_general_dilated(
            xx, w, window_strides=(1,), padding=[(pad, pad)],
            rhs_dilation=(dilation,), dimension_numbers=("NCH", "OIH", "NCH"))

    xs = [conv1d(x, params[f"conv_{i + 1}"], (conv_kernels[i] // 2) * dilation)
          for i in range(4)]

    def se(y):
        m = jnp.mean(y, axis=2)                                          # (B, C)
        h = jnp.einsum("rc,bc->br", params["fc1_w"][:, :, 0], m) + params["fc1_b"]
        h = jnp.maximum(h, 0.0)
        s = jnp.einsum("cr,br->bc", params["fc2_w"][:, :, 0], h) + params["fc2_b"]
        return jax.nn.sigmoid(s)                                         # (B, C)

    ses = jnp.stack([se(y) for y in xs], axis=1)                         # (B, 4, C)
    att = jax.nn.softmax(ses, axis=1)
    fws = [xs[i] * att[:, i, :, None] for i in range(4)]
    return jnp.concatenate([fws[3], fws[2], fws[1], fws[0]], axis=1)     # (B, 4C, T)


if __name__ == "__main__":
    B, inplans, T = 2, 8, 32
    planes, dilation = 16, 2
    conv_kernels = (1, 3, 5, 7)
    C = planes // 4                      # split_channel
    Cr = C // 2                          # SE reduction=2

    key = jax.random.PRNGKey(0)
    keys = jax.random.split(key, 9)
    params = {
        "conv_1": 0.2 * jax.random.normal(keys[0], (C, inplans, conv_kernels[0]), jnp.float32),
        "conv_2": 0.2 * jax.random.normal(keys[1], (C, inplans, conv_kernels[1]), jnp.float32),
        "conv_3": 0.2 * jax.random.normal(keys[2], (C, inplans, conv_kernels[2]), jnp.float32),
        "conv_4": 0.2 * jax.random.normal(keys[3], (C, inplans, conv_kernels[3]), jnp.float32),
        "fc1_w": 0.2 * jax.random.normal(keys[4], (Cr, C, 1), jnp.float32),
        "fc1_b": 0.1 * jax.random.normal(keys[5], (Cr,), jnp.float32),
        "fc2_w": 0.2 * jax.random.normal(keys[6], (C, Cr, 1), jnp.float32),
        "fc2_b": 0.1 * jax.random.normal(keys[7], (C,), jnp.float32),
    }
    x = jax.random.normal(keys[8], (B, inplans, T), jnp.float32)

    # Round activations + conv weights to bf16-representable values so the f32
    # reference and the bf16-fed MXU see identical operands (kernel accumulates in f32).
    rt = lambda a: a.astype(jnp.bfloat16).astype(jnp.float32)
    x = rt(x)
    for i in range(4):
        params[f"conv_{i + 1}"] = rt(params[f"conv_{i + 1}"])

    out = jax.block_until_ready(psa_forward(x, params, dilation, conv_kernels))
    ref = psa_reference(x, params, dilation, conv_kernels)

    assert out.shape == (B, planes, T), out.shape
    if not jnp.allclose(out, ref, atol=2e-2, rtol=2e-2):
        raise AssertionError(
            f"mismatch: max abs err = {float(jnp.max(jnp.abs(out - ref)))}")
    print("KERNEL_OK")
</pallas_src>

<mosaic_0001>
module attributes {stable_mosaic.version = 11 : i64} {
  func.func @kernel(%arg0: i32, %arg1: memref<1x44x8xbf16, #tpu.memory_space<vmem>>, %arg2: memref<7x8x16xbf16, #tpu.memory_space<vmem>>, %arg3: memref<4x2xf32, #tpu.memory_space<vmem>>, %arg4: memref<1x2xf32, #tpu.memory_space<vmem>>, %arg5: memref<2x4xf32, #tpu.memory_space<vmem>>, %arg6: memref<1x4xf32, #tpu.memory_space<vmem>>, %arg7: memref<1x32x16xf32, #tpu.memory_space<vmem>>, %arg8: memref<32x16xf32, #tpu.memory_space<vmem>>) attributes {dimension_semantics = [#tpu.dimension_semantics<parallel>], iteration_bounds = array<i64: 2>, scalar_prefetch = 0 : i64, scratch_operands = 1 : i64, tpu.core_type = #tpu.core_type<tc>, window_params = [{transform_indices = @transform_0, window_bounds = array<i64: 1, 44, 8>}, {pipeline_mode = #tpu.pipeline_mode<synchronous>, transform_indices = @transform_1, window_bounds = array<i64: 7, 8, 16>}, {pipeline_mode = #tpu.pipeline_mode<synchronous>, transform_indices = @transform_2, window_bounds = array<i64: 4, 2>}, {pipeline_mode = #tpu.pipeline_mode<synchronous>, transform_indices = @transform_3, window_bounds = array<i64: 1, 2>}, {pipeline_mode = #tpu.pipeline_mode<synchronous>, transform_indices = @transform_4, window_bounds = array<i64: 2, 4>}, {pipeline_mode = #tpu.pipeline_mode<synchronous>, transform_indices = @transform_5, window_bounds = array<i64: 1, 4>}, {transform_indices = @transform_6, window_bounds = array<i64: 1, 32, 16>}]} {
    %c0 = arith.constant 0 : index
    %c0_0 = arith.constant 0 : index
    %c0_1 = arith.constant 0 : index
    %0 = vector.load %arg1[%c0, %c0_0, %c0_1] : memref<1x44x8xbf16, #tpu.memory_space<vmem>>, vector<1x32x8xbf16>
    %1 = vector.shape_cast %0 : vector<1x32x8xbf16> to vector<32x8xbf16>
    %c0_2 = arith.constant 0 : index
    %c0_3 = arith.constant 0 : index
    %c0_4 = arith.constant 0 : index
    %2 = vector.load %arg2[%c0_2, %c0_3, %c0_4] : memref<7x8x16xbf16, #tpu.memory_space<vmem>>, vector<1x8x16xbf16>
    %3 = vector.shape_cast %2 : vector<1x8x16xbf16> to vector<8x16xbf16>
    %cst = arith.constant dense<0.000000e+00> : vector<32x16xf32>
    %4 = tpu.matmul %1, %3, %cst {dimension_numbers = #tpu.dot_dimension_numbers<[1], [0], [0], [1], [0, 0, 1, 1], [], []>} : vector<32x8xbf16>, vector<8x16xbf16>, vector<32x16xf32> -> vector<32x16xf32>
    %c0_5 = arith.constant 0 : index
    %c0_6 = arith.constant 0 : index
    %5 = vector.load %arg8[%c0_5, %c0_6] : memref<32x16xf32, #tpu.memory_space<vmem>>, vector<32x16xf32>
    tpu.vector_store %arg8[%c0_5, %c0_6], %4 {strides = array<i32>} : memref<32x16xf32, #tpu.memory_space<vmem>>, vector<32x16xf32>,
    %c0_7 = arith.constant 0 : index
    %c2 = arith.constant 2 : index
    %c0_8 = arith.constant 0 : index
    %6 = vector.load %arg1[%c0_7, %c2, %c0_8] : memref<1x44x8xbf16, #tpu.memory_space<vmem>>, vector<1x32x8xbf16>
    %7 = vector.shape_cast %6 : vector<1x32x8xbf16> to vector<32x8xbf16>
    %c0_9 = arith.constant 0 : index
    %c0_10 = arith.constant 0 : index
    %8 = vector.load %arg8[%c0_9, %c0_10] : memref<32x16xf32, #tpu.memory_space<vmem>>, vector<32x16xf32>
    %c1 = arith.constant 1 : index
    %c0_11 = arith.constant 0 : index
    %c0_12 = arith.constant 0 : index
    %9 = vector.load %arg2[%c1, %c0_11, %c0_12] : memref<7x8x16xbf16, #tpu.memory_space<vmem>>, vector<1x8x16xbf16>
    %10 = vector.shape_cast %9 : vector<1x8x16xbf16> to vector<8x16xbf16>
    %cst_13 = arith.constant dense<0.000000e+00> : vector<32x16xf32>
    %11 = tpu.matmul %7, %10, %cst_13 {dimension_numbers = #tpu.dot_dimension_numbers<[1], [0], [0], [1], [0, 0, 1, 1], [], []>} : vector<32x8xbf16>, vector<8x16xbf16>, vector<32x16xf32> -> vector<32x16xf32>
    %12 = arith.addf %8, %11 : vector<32x16xf32>
    %c0_14 = arith.constant 0 : index
    %c0_15 = arith.constant 0 : index
    %13 = vector.load %arg8[%c0_14, %c0_15] : memref<32x16xf32, #tpu.memory_space<vmem>>, vector<32x16xf32>
    tpu.vector_store %arg8[%c0_14, %c0_15], %12 {strides = array<i32>} : memref<32x16xf32, #tpu.memory_space<vmem>>, vector<32x16xf32>,
    %c0_16 = arith.constant 0 : index
    %c4 = arith.constant 4 : index
    %c0_17 = arith.constant 0 : index
    %14 = vector.load %arg1[%c0_16, %c4, %c0_17] : memref<1x44x8xbf16, #tpu.memory_space<vmem>>, vector<1x32x8xbf16>
    %15 = vector.shape_cast %14 : vector<1x32x8xbf16> to vector<32x8xbf16>
    %c0_18 = arith.constant 0 : index
    %c0_19 = arith.constant 0 : index
    %16 = vector.load %arg8[%c0_18, %c0_19] : memref<32x16xf32, #tpu.memory_space<vmem>>, vector<32x16xf32>
    %c2_20 = arith.constant 2 : index
    %c0_21 = arith.constant 0 : index
    %c0_22 = arith.constant 0 : index
    %17 = vector.load %arg2[%c2_20, %c0_21, %c0_22] : memref<7x8x16xbf16, #tpu.memory_space<vmem>>, vector<1x8x16xbf16>
    %18 = vector.shape_cast %17 : vector<1x8x16xbf16> to vector<8x16xbf16>
    %cst_23 = arith.constant dense<0.000000e+00> : vector<32x16xf32>
    %19 = tpu.matmul %15, %18, %cst_23 {dimension_numbers = #tpu.dot_dimension_numbers<[1], [0], [0], [1], [0, 0, 1, 1], [], []>} : vector<32x8xbf16>, vector<8x16xbf16>, vector<32x16xf32> -> vector<32x16xf32>
    %20 = arith.addf %16, %19 : vector<32x16xf32>
    %c0_24 = arith.constant 0 : index
    %c0_25 = arith.constant 0 : index
    %21 = vector.load %arg8[%c0_24, %c0_25] : memref<32x16xf32, #tpu.memory_space<vmem>>, vector<32x16xf32>
    tpu.vector_store %arg8[%c0_24, %c0_25], %20 {strides = array<i32>} : memref<32x16xf32, #tpu.memory_space<vmem>>, vector<32x16xf32>,
    %c0_26 = arith.constant 0 : index
    %c6 = arith.constant 6 : index
    %c0_27 = arith.constant 0 : index
    %22 = vector.load %arg1[%c0_26, %c6, %c0_27] : memref<1x44x8xbf16, #tpu.memory_space<vmem>>, vector<1x32x8xbf16>
    %23 = vector.shape_cast %22 : vector<1x32x8xbf16> to vector<32x8xbf16>
    %c0_28 = arith.constant 0 : index
    %c0_29 = arith.constant 0 : index
    %24 = vector.load %arg8[%c0_28, %c0_29] : memref<32x16xf32, #tpu.memory_space<vmem>>, vector<32x16xf32>
    %c3 = arith.constant 3 : index
    %c0_30 = arith.constant 0 : index
    %c0_31 = arith.constant 0 : index
    %25 = vector.load %arg2[%c3, %c0_30, %c0_31] : memref<7x8x16xbf16, #tpu.memory_space<vmem>>, vector<1x8x16xbf16>
    %26 = vector.shape_cast %25 : vector<1x8x16xbf16> to vector<8x16xbf16>
    %cst_32 = arith.constant dense<0.000000e+00> : vector<32x16xf32>
    %27 = tpu.matmul %23, %26, %cst_32 {dimension_numbers = #tpu.dot_dimension_numbers<[1], [0], [0], [1], [0, 0, 1, 1], [], []>} : vector<32x8xbf16>, vector<8x16xbf16>, vector<32x16xf32> -> vector<32x16xf32>
    %28 = arith.addf %24, %27 : vector<32x16xf32>
    %c0_33 = arith.constant 0 : index
    %c0_34 = arith.constant 0 : index
    %29 = vector.load %arg8[%c0_33, %c0_34] : memref<32x16xf32, #tpu.memory_space<vmem>>, vector<32x16xf32>
    tpu.vector_store %arg8[%c0_33, %c0_34], %28 {strides = array<i32>} : memref<32x16xf32, #tpu.memory_space<vmem>>, vector<32x16xf32>,
    %c0_35 = arith.constant 0 : index
    %c8 = arith.constant 8 : index
    %c0_36 = arith.constant 0 : index
    %30 = vector.load %arg1[%c0_35, %c8, %c0_36] : memref<1x44x8xbf16, #tpu.memory_space<vmem>>, vector<1x32x8xbf16>
    %31 = vector.shape_cast %30 : vector<1x32x8xbf16> to vector<32x8xbf16>
    %c0_37 = arith.constant 0 : index
    %c0_38 = arith.constant 0 : index
    %32 = vector.load %arg8[%c0_37, %c0_38] : memref<32x16xf32, #tpu.memory_space<vmem>>, vector<32x16xf32>
    %c4_39 = arith.constant 4 : index
    %c0_40 = arith.constant 0 : index
    %c0_41 = arith.constant 0 : index
    %33 = vector.load %arg2[%c4_39, %c0_40, %c0_41] : memref<7x8x16xbf16, #tpu.memory_space<vmem>>, vector<1x8x16xbf16>
    %34 = vector.shape_cast %33 : vector<1x8x16xbf16> to vector<8x16xbf16>
    %cst_42 = arith.constant dense<0.000000e+00> : vector<32x16xf32>
    %35 = tpu.matmul %31, %34, %cst_42 {dimension_numbers = #tpu.dot_dimension_numbers<[1], [0], [0], [1], [0, 0, 1, 1], [], []>} : vector<32x8xbf16>, vector<8x16xbf16>, vector<32x16xf32> -> vector<32x16xf32>
    %36 = arith.addf %32, %35 : vector<32x16xf32>
    %c0_43 = arith.constant 0 : index
    %c0_44 = arith.constant 0 : index
    %37 = vector.load %arg8[%c0_43, %c0_44] : memref<32x16xf32, #tpu.memory_space<vmem>>, vector<32x16xf32>
    tpu.vector_store %arg8[%c0_43, %c0_44], %36 {strides = array<i32>} : memref<32x16xf32, #tpu.memory_space<vmem>>, vector<32x16xf32>,
    %c0_45 = arith.constant 0 : index
    %c10 = arith.constant 10 : index
    %c0_46 = arith.constant 0 : index
    %38 = vector.load %arg1[%c0_45, %c10, %c0_46] : memref<1x44x8xbf16, #tpu.memory_space<vmem>>, vector<1x32x8xbf16>
    %39 = vector.shape_cast %38 : vector<1x32x8xbf16> to vector<32x8xbf16>
    %c0_47 = arith.constant 0 : index
    %c0_48 = arith.constant 0 : index
    %40 = vector.load %arg8[%c0_47, %c0_48] : memref<32x16xf32, #tpu.memory_space<vmem>>, vector<32x16xf32>
    %c5 = arith.constant 5 : index
    %c0_49 = arith.constant 0 : index
    %c0_50 = arith.constant 0 : index
    %41 = vector.load %arg2[%c5, %c0_49, %c0_50] : memref<7x8x16xbf16, #tpu.memory_space<vmem>>, vector<1x8x16xbf16>
    %42 = vector.shape_cast %41 : vector<1x8x16xbf16> to vector<8x16xbf16>
    %cst_51 = arith.constant dense<0.000000e+00> : vector<32x16xf32>
    %43 = tpu.matmul %39, %42, %cst_51 {dimension_numbers = #tpu.dot_dimension_numbers<[1], [0], [0], [1], [0, 0, 1, 1], [], []>} : vector<32x8xbf16>, vector<8x16xbf16>, vector<32x16xf32> -> vector<32x16xf32>
    %44 = arith.addf %40, %43 : vector<32x16xf32>
    %c0_52 = arith.constant 0 : index
    %c0_53 = arith.constant 0 : index
    %45 = vector.load %arg8[%c0_52, %c0_53] : memref<32x16xf32, #tpu.memory_space<vmem>>, vector<32x16xf32>
    tpu.vector_store %arg8[%c0_52, %c0_53], %44 {strides = array<i32>} : memref<32x16xf32, #tpu.memory_space<vmem>>, vector<32x16xf32>,
    %c0_54 = arith.constant 0 : index
    %c12 = arith.constant 12 : index
    %c0_55 = arith.constant 0 : index
    %46 = vector.load %arg1[%c0_54, %c12, %c0_55] : memref<1x44x8xbf16, #tpu.memory_space<vmem>>, vector<1x32x8xbf16>
    %47 = vector.shape_cast %46 : vector<1x32x8xbf16> to vector<32x8xbf16>
    %c0_56 = arith.constant 0 : index
    %c0_57 = arith.constant 0 : index
    %48 = vector.load %arg8[%c0_56, %c0_57] : memref<32x16xf32, #tpu.memory_space<vmem>>, vector<32x16xf32>
    %c6_58 = arith.constant 6 : index
    %c0_59 = arith.constant 0 : index
    %c0_60 = arith.constant 0 : index
    %49 = vector.load %arg2[%c6_58, %c0_59, %c0_60] : memref<7x8x16xbf16, #tpu.memory_space<vmem>>, vector<1x8x16xbf16>
    %50 = vector.shape_cast %49 : vector<1x8x16xbf16> to vector<8x16xbf16>
    %cst_61 = arith.constant dense<0.000000e+00> : vector<32x16xf32>
    %51 = tpu.matmul %47, %50, %cst_61 {dimension_numbers = #tpu.dot_dimension_numbers<[1], [0], [0], [1], [0, 0, 1, 1], [], []>} : vector<32x8xbf16>, vector<8x16xbf16>, vector<32x16xf32> -> vector<32x16xf32>
    %52 = arith.addf %48, %51 : vector<32x16xf32>
    %c0_62 = arith.constant 0 : index
    %c0_63 = arith.constant 0 : index
    %53 = vector.load %arg8[%c0_62, %c0_63] : memref<32x16xf32, #tpu.memory_space<vmem>>, vector<32x16xf32>
    tpu.vector_store %arg8[%c0_62, %c0_63], %52 {strides = array<i32>} : memref<32x16xf32, #tpu.memory_space<vmem>>, vector<32x16xf32>,
    %c0_64 = arith.constant 0 : index
    %c0_65 = arith.constant 0 : index
    %54 = vector.load %arg8[%c0_64, %c0_65] : memref<32x16xf32, #tpu.memory_space<vmem>>, vector<32x16xf32>
    %cst_66 = arith.constant dense<0.000000e+00> : vector<16xf32>
    %55 = vector.multi_reduction <add>, %54, %cst_66 [0] : vector<32x16xf32> to vector<16xf32>
    %56 = vector.shape_cast %55 : vector<16xf32> to vector<1x16xf32>
    %cst_67 = arith.constant 3.125000e-02 : f32
    %57 = vector.broadcast %cst_67 : f32 to vector<1x16xf32>
    %58 = arith.mulf %56, %57 : vector<1x16xf32>
    %59 = vector.extract_strided_slice %58 {offsets = [0, 0], sizes = [1, 4], strides = [1, 1]} : vector<1x16xf32> to vector<1x4xf32>
    %60 = vector.extract_strided_slice %58 {offsets = [0, 4], sizes = [1, 4], strides = [1, 1]} : vector<1x16xf32> to vector<1x4xf32>
    %61 = vector.extract_strided_slice %58 {offsets = [0, 8], sizes = [1, 4], strides = [1, 1]} : vector<1x16xf32> to vector<1x4xf32>
    %62 = vector.extract_strided_slice %58 {offsets = [0, 12], sizes = [1, 4], strides = [1, 1]} : vector<1x16xf32> to vector<1x4xf32>
    %63 = tpu.concatenate %59, %60, %61, %62 in 0 : vector<1x4xf32>, vector<1x4xf32>, vector<1x4xf32>, vector<1x4xf32> -> vector<4x4xf32>
    %c0_68 = arith.constant 0 : index
    %c0_69 = arith.constant 0 : index
    %64 = vector.load %arg3[%c0_68, %c0_69] : memref<4x2xf32, #tpu.memory_space<vmem>>, vector<4x2xf32>
    %cst_70 = arith.constant dense<0.000000e+00> : vector<4x2xf32>
    %65 = tpu.matmul %63, %64, %cst_70 {dimension_numbers = #tpu.dot_dimension_numbers<[1], [0], [0], [1], [0, 0, 1, 1], [], []>} : vector<4x4xf32>, vector<4x2xf32>, vector<4x2xf32> -> vector<4x2xf32>
    %c0_71 = arith.constant 0 : index
    %c0_72 = arith.constant 0 : index
    %66 = vector.load %arg4[%c0_71, %c0_72] : memref<1x2xf32, #tpu.memory_space<vmem>>, vector<1x2xf32>
    %67 = vector.broadcast %66 : vector<1x2xf32> to vector<4x2xf32>
    %68 = arith.addf %65, %67 : vector<4x2xf32>
    %cst_73 = arith.constant 0.000000e+00 : f32
    %69 = vector.broadcast %cst_73 : f32 to vector<4x2xf32>
    %70 = arith.maximumf %68, %69 : vector<4x2xf32>
    %c0_74 = arith.constant 0 : index
    %c0_75 = arith.constant 0 : index
    %71 = vector.load %arg5[%c0_74, %c0_75] : memref<2x4xf32, #tpu.memory_space<vmem>>, vector<2x4xf32>
    %cst_76 = arith.constant dense<0.000000e+00> : vector<4x4xf32>
    %72 = tpu.matmul %70, %71, %cst_76 {dimension_numbers = #tpu.dot_dimension_numbers<[1], [0], [0], [1], [0, 0, 1, 1], [], []>} : vector<4x2xf32>, vector<2x4xf32>, vector<4x4xf32> -> vector<4x4xf32>
    %c0_77 = arith.constant 0 : index
    %c0_78 = arith.constant 0 : index
    %73 = vector.load %arg6[%c0_77, %c0_78] : memref<1x4xf32, #tpu.memory_space<vmem>>, vector<1x4xf32>
    %74 = vector.broadcast %73 : vector<1x4xf32> to vector<4x4xf32>
    %75 = arith.addf %72, %74 : vector<4x4xf32>
    %76 = arith.negf %75 : vector<4x4xf32>
    %77 = math.exp %76 : vector<4x4xf32>
    %cst_79 = arith.constant 1.000000e+00 : f32
    %78 = vector.broadcast %cst_79 : f32 to vector<4x4xf32>
    %79 = arith.addf %78, %77 : vector<4x4xf32>
    %80 = arith.divf %78, %79 : vector<4x4xf32>
    %cst_80 = arith.constant dense<0xFF800000> : vector<4xf32>
    %81 = vector.multi_reduction <maximumf>, %80, %cst_80 [0] : vector<4x4xf32> to vector<4xf32>
    %82 = vector.shape_cast %81 : vector<4xf32> to vector<1x4xf32>
    %83 = vector.broadcast %82 : vector<1x4xf32> to vector<4x4xf32>
    %84 = arith.subf %80, %83 : vector<4x4xf32>
    %85 = math.exp %84 : vector<4x4xf32>
    %cst_81 = arith.constant dense<0.000000e+00> : vector<4xf32>
    %86 = vector.multi_reduction <add>, %85, %cst_81 [0] : vector<4x4xf32> to vector<4xf32>
    %87 = vector.shape_cast %86 : vector<4xf32> to vector<1x4xf32>
    %88 = tpu.reciprocal %87 {approx = true} : vector<1x4xf32> -> vector<1x4xf32>
    %89 = vector.broadcast %88 : vector<1x4xf32> to vector<4x4xf32>
    %90 = arith.mulf %85, %89 : vector<4x4xf32>
    %91 = vector.extract_strided_slice %90 {offsets = [0, 0], sizes = [1, 4], strides = [1, 1]} : vector<4x4xf32> to vector<1x4xf32>
    %92 = vector.extract_strided_slice %90 {offsets = [1, 0], sizes = [1, 4], strides = [1, 1]} : vector<4x4xf32> to vector<1x4xf32>
    %93 = vector.extract_strided_slice %90 {offsets = [2, 0], sizes = [1, 4], strides = [1, 1]} : vector<4x4xf32> to vector<1x4xf32>
    %94 = vector.extract_strided_slice %90 {offsets = [3, 0], sizes = [1, 4], strides = [1, 1]} : vector<4x4xf32> to vector<1x4xf32>
    %95 = tpu.concatenate %91, %92, %93, %94 in 1 : vector<1x4xf32>, vector<1x4xf32>, vector<1x4xf32>, vector<1x4xf32> -> vector<1x16xf32>
    %96 = vector.broadcast %95 : vector<1x16xf32> to vector<32x16xf32>
    %97 = arith.mulf %54, %96 : vector<32x16xf32>
    %c0_82 = arith.constant 0 : index
    %c0_83 = arith.constant 0 : index
    %c0_84 = arith.constant 0 : index
    %98 = vector.load %arg7[%c0_82, %c0_83, %c0_84] : memref<1x32x16xf32, #tpu.memory_space<vmem>>, vector<1x32x16xf32>
    %99 = vector.shape_cast %98 : vector<1x32x16xf32> to vector<32x16xf32>
    %100 = vector.shape_cast %97 : vector<32x16xf32> to vector<1x32x16xf32>
    tpu.vector_store %arg7[%c0_82, %c0_83, %c0_84], %100 {strides = array<i32>} : memref<1x32x16xf32, #tpu.memory_space<vmem>>, vector<1x32x16xf32>,
    return
  }
  func.func @transform_0(%arg0: i32) -> (i32, i32, i32) {
    %c0_i32 = arith.constant 0 : i32
    %c0_i32_0 = arith.constant 0 : i32
    %c0_i32_1 = arith.constant 0 : i32
    return %arg0, %c0_i32, %c0_i32_0 : i32, i32, i32
  }
  func.func @transform_1(%arg0: i32) -> (i32, i32, i32) {
    %c0_i32 = arith.constant 0 : i32
    %c0_i32_0 = arith.constant 0 : i32
    %c0_i32_1 = arith.constant 0 : i32
    %c0_i32_2 = arith.constant 0 : i32
    return %c0_i32, %c0_i32_0, %c0_i32_1 : i32, i32, i32
  }
  func.func @transform_2(%arg0: i32) -> (i32, i32) {
    %c0_i32 = arith.constant 0 : i32
    %c0_i32_0 = arith.constant 0 : i32
    %c0_i32_1 = arith.constant 0 : i32
    return %c0_i32, %c0_i32_0 : i32, i32
  }
  func.func @transform_3(%arg0: i32) -> (i32, i32) {
    %c0_i32 = arith.constant 0 : i32
    %c0_i32_0 = arith.constant 0 : i32
    %c0_i32_1 = arith.constant 0 : i32
    return %c0_i32, %c0_i32_0 : i32, i32
  }
  func.func @transform_4(%arg0: i32) -> (i32, i32) {
    %c0_i32 = arith.constant 0 : i32
    %c0_i32_0 = arith.constant 0 : i32
    %c0_i32_1 = arith.constant 0 : i32
    return %c0_i32, %c0_i32_0 : i32, i32
  }
  func.func @transform_5(%arg0: i32) -> (i32, i32) {
    %c0_i32 = arith.constant 0 : i32
    %c0_i32_0 = arith.constant 0 : i32
    %c0_i32_1 = arith.constant 0 : i32
    return %c0_i32, %c0_i32_0 : i32, i32
  }
  func.func @transform_6(%arg0: i32) -> (i32, i32, i32) {
    %c0_i32 = arith.constant 0 : i32
    %c0_i32_0 = arith.constant 0 : i32
    %c0_i32_1 = arith.constant 0 : i32
    return %arg0, %c0_i32, %c0_i32_0 : i32, i32, i32
  }
}

</mosaic_0001>

<bundles_post_ra>
// kernel: tpu_custom_call.1
= control target key start
LH: loop header
LB: loop body
LE: loop exit
PB: predicated region body
PF: predicated region fallthrough
CT: control target
= control target key end

     0   :  { %s1448_s21 = smov 0   ;;  %s1623_s0 = inlined_call_operand.vmem [shape: bf16[2,44,8], index: 0, kind: input, shape index: {}]   ;;  %s1624_s1 = inlined_call_operand.vmem [shape: bf16[7,8,16], index: 1, kind: input, shape index: {}]   ;;  %s1625_s2 = inlined_call_operand.vmem [shape: f32[4,2], index: 2, kind: input, shape index: {}]   ;;  %s1626_s3 = inlined_call_operand.vmem [shape: f32[1,2], index: 3, kind: input, shape index: {}]   ;;  %s1627_s4 = inlined_call_operand.vmem [shape: f32[2,4], index: 4, kind: input, shape index: {}]   ;;  %s1628_s5 = inlined_call_operand.vmem [shape: f32[1,4], index: 5, kind: input, shape index: {}]   ;;  %s1629_s6 = inlined_call_operand.vmem [shape: f32[2,32,16], index: 6, kind: output, shape index: {}]  }
   0x1 LB: > { %s1212_s22 = sadd.s32 4294967295, %s1403_s21   ;;  %p1216_p0 = scmp.ge.s32.totalorder %s1403_s21, 1  ;;  %s1403_s21 = sphi %s1448_s21, %s16_s21  }
   0x2   : > { %p212_p1 = scmp.lt.s32.totalorder %s1403_s21, 3 }
   0x4   : > { %p213_p2 = pnand %p1216_p0, %p212_p1 }
   0x5   : > { %v257_v0 = vld [vmem:[%s1624_s1] sm:$0xf] (!%p213_p2)  ;;  %vm275_vm0 = vcmask (!%p213_p2), 1043456   ;;  %p242_p3 = scmp.lt.s32.totalorder (!%p213_p2), %s1212_s22, 1  ;;  %v1224_v2 = vld [vmem:[%s1624_s1 + $0x4] sm:$0xf] (!%p213_p2) }
   0x6   : > { %216 = sbr.rel (%p213_p2) target bundleno = 1082 (0x43a), region = 44  ;;  %1346 = vmatprep.subr.msk.bf16.mxu0 (!%p213_p2), %vm275_vm0, %v257_v0  ;;  %v277_v1 = vsel (!%p213_p2), %vm275_vm0, %v257_v0, 0  ;;  %v1230_v3 = vld [vmem:[%s1624_s1 + $0x8] sm:$0xf] (!%p213_p2)  ;;  %1347 = vmatprep.subr.msk.bf16.mxu1 (!%p213_p2), %vm275_vm0, %v1224_v2  ;;  %v370_v4 = vsel (!%p213_p2), %vm275_vm0, %v1224_v2, 0  ;;  %vm268_vm1 = vcmask (!%p213_p2), 64512  }
   0x7   : > { %1295 = vmatpush3.bf16.msra.mxu0 (!%p213_p2), %v277_v1  ;;  %v1236_v5 = vld [vmem:[%s1624_s1 + $0xc] sm:$0xf] (!%p213_p2)  ;;  %1301 = vmatpush3.bf16.msra.mxu1 (!%p213_p2), %v370_v4  ;;  %vm357_vm2 = vcmask (!%p213_p2), 1046528   ;;  %vm453_vm3 = vcmask (!%p213_p2), 1045504   ;;  %v1242_v7 = vld [vmem:[%s1624_s1 + $0x10] sm:$0xf] (!%p213_p2) }
   0x8   : > { %1348 = vmatprep.subr.msk.bf16.mxu0 (!%p213_p2), %vm275_vm0, %v1230_v3  ;;  %1349 = vmatprep.subr.msk.bf16.mxu1 (!%p213_p2), %vm275_vm0, %v1236_v5  ;;  %v466_v9 = vsel (!%p213_p2), %vm275_vm0, %v1230_v3, 0  ;;  %v562_v12 = vsel (!%p213_p2), %vm275_vm0, %v1236_v5, 0  ;;  %vm549_vm4 = vcmask (!%p213_p2), 1044480   ;;  %v1247_v19 = vld [vmem:[%s1624_s1 + $0x14] sm:$0xf] (!%p213_p2)  ;;  %v648_v33 = vsel (!%p213_p2), %vm275_vm0, %v1242_v7, 0 }
   0x9   : > { %v1253_v30 = vld [vmem:[%s1624_s1 + $0x18] sm:$0xf] (!%p213_p2)  ;;  %v743_v41 = vsel (!%p213_p2), %vm275_vm0, %v1247_v19, 0  ;;  %v931_v58 = vld [vmem:[%s1625_s2] sm:$0xf] (!%p213_p2)  ;;  %v1405_v59 = vmov (!%p213_p2), 0.0  }
   0xa   : > { %v838_v51 = vsel (!%p213_p2), %vm275_vm0, %v1253_v30, 0  ;;  %vm328_vm5 = vcmask (!%p213_p2), 130048   ;;  %vm1406_vm6 = vmmov (!%p213_p2), 0   ;;  %s1407_s19 = smov (!%p213_p2), 116   ;;  %s1408_s20 = smov (!%p213_p2), 124   ;;  %vm925_vm7 = vcmask (!%p213_p2), 1040384  }
   0xb   : > { %s1409_s23 = smov (!%p213_p2), 120   ;;  %vm927_vm8 = vcmask (!%p213_p2), 1041408   ;;  %vm929_vm9 = vcmask (!%p213_p2), 1042432   ;;  %vm939_vm10 = vcmask (!%p213_p2), 31744   ;;  %vm1025_vm11 = vcmask (!%p213_p2), 15360   ;;  %s1410_s30 = smov (!%p213_p2), 8  }
   0xc   : > { %vm1108_vm12 = vcmask (!%p213_p2), 27648   ;;  %s1412_s8 = smov (!%p213_p2), 12   ;;  %vm1143_vm13 = vcmask (!%p213_p2), 97280  }
   0xd   : > { %s1631_s22 = smov (!%p242_p3, %s1212_s22), 1 }
   0xe   : > { %s1353_s7 = smul.u32 24, %s1631_s22  ;;  %s1268_s9 = sshll.u32 %s1631_s22, 5 }
   0xf   : > { %s251_s12 = scalar_lea.vmem %s1629_s6, %s1268_s9 }
  0x10   : > { %s1480_s10 = scalar_lea.vmem %s1623_s0, %s1353_s7  ;;  %s1411_s7 = smov 4  }
  0x11   : > { %v1370_v6 = vld [vmem:[%s1480_s10] sm:$0xff]   ;;  %v1371_v8 = vld [vmem:[%s1480_s10 + $0x8] sm:$0xff]   ;;  %v1374_v13 = vld [vmem:[%s1480_s10 + $0x10] ss:$0 sps:$4 sm:$0x11]  }
  0x12   : > { %1296 = vmatprep.mubr.msk.bf16.mxu0 %vm268_vm1, %v1370_v6  ;;  %v1372_v10 = vld [vmem:[%s1480_s10] sm:$0xfe]   ;;  %v1373_v11 = vld [vmem:[%s1480_s10 + $0x8] sm:$0xff]   ;;  %v361_v17 = vrot.slane %v1374_v13, 1 }
  0x13   : > { %1297 = vmatmul.mubr.msk.bf16.vlgmr.msra.gmra.mrb[0].mxu0 %vm268_vm1, %v1371_v8  ;;  %v1376_v14 = vld [vmem:[%s1480_s10 + $0x8] sm:$0xff]   ;;  %v358_v15 = vrot.slane %v1372_v10, 1  ;;  %v359_v16 = vrot.slane %v1373_v11, 1  ;;  %v1375_v21 = vld [vmem:[%s1480_s10] sm:$0xfc]  }
  0x14   : > { %1307 = vmatpush3.bf16.msra.mxu0 %v466_v9  ;;  %v455_v18 = vrot.slane %v1376_v14, 2  ;;  %v1377_v23 = vld [vmem:[%s1480_s10 + $0x10] ss:$0 sps:$4 sm:$0x33]   ;;  %v1379_v24 = vld [vmem:[%s1480_s10 + $0x8] sm:$0xff]   ;;  %v454_v25 = vrot.slane %v1375_v21, 2 }
  0x15   : > { %1350 = vmatprep.subr.msk.bf16.mxu0 %vm275_vm0, %v1242_v7  ;;  %v360_v20 = vsel %vm357_vm2, %v358_v15, %v359_v16  ;;  %v362_v22 = vsel %vm357_vm2, %v359_v16, %v361_v17  ;;  %v1381_v26 = vld [vmem:[%s1480_s10 + $0x4] sm:$0xff]   ;;  %v457_v27 = vrot.slane %v1377_v23, 2  ;;  %v551_v29 = vrot.slane %v1379_v24, 3  ;;  %v1380_v32 = vld [vmem:[%s1480_s10 + $0x10] ss:$0 sps:$4 sm:$0x77]  }
  0x16   : > { %1302 = vmatprep.mubr.msk.bf16.mxu1 %vm268_vm1, %v360_v20  ;;  %v1378_v28 = vld [vmem:[%s1480_s10] sm:$0xf8]   ;;  %v456_v31 = vsel %vm453_vm3, %v454_v25, %v455_v18  ;;  %v1384_v36 = vld [vmem:[%s1480_s10 + $0xc] sm:$0xff]   ;;  %v553_v37 = vrot.slane %v1380_v32, 3 }
  0x17   : > { %1303 = vmatmul.mubr.msk.bf16.vlgmr.msra.gmra.mrb[0].mxu1 %vm268_vm1, %v362_v22  ;;  %1308 = vmatprep.mubr.msk.bf16.mxu0 %vm268_vm1, %v456_v31  ;;  %v458_v34 = vsel %vm453_vm3, %v455_v18, %v457_v27  ;;  %v550_v35 = vrot.slane %v1378_v28, 3  ;;  %v1387_v38 = vld [vmem:[%s1480_s10 + $0xc] sm:$0xff]   ;;  %v1383_v42 = vld [vmem:[%s1480_s10 + $0x4] sm:$0xfe]   ;;  %v732_v43 = vrot.slane %v1384_v36, 1 }
  0x18   : > { %1313 = vmatpush3.bf16.msra.mxu1 %v562_v12  ;;  %v554_v40 = vsel %vm549_vm4, %v551_v29, %v553_v37  ;;  %v1385_v44 = vld [vmem:[%s1480_s10 + $0x14] ss:$0 sps:$4 sm:$0x11]   ;;  %v1382_v45 = vld [vmem:[%s1480_s10 + $0xc] sm:$0xff]   ;;  %v731_v46 = vrot.slane %v1383_v42, 1  ;;  %v827_v49 = vrot.slane %v1387_v38, 2 }
  0x19   : > { %1351 = vmatprep.subr.msk.bf16.mxu1 %vm275_vm0, %v1247_v19  ;;  %v552_v39 = vsel %vm549_vm4, %v550_v35, %v551_v29  ;;  %v734_v47 = vrot.slane %v1385_v44, 1  ;;  %v1386_v48 = vld [vmem:[%s1480_s10 + $0x4] sm:$0xfc]   ;;  %v1388_v52 = vld [vmem:[%s1480_s10 + $0x14] ss:$0 sps:$4 sm:$0x33]  }
  0x1a   : > { %1314 = vmatprep.mubr.msk.bf16.mxu1 %vm268_vm1, %v552_v39  ;;  %v733_v50 = vsel %vm357_vm2, %v731_v46, %v732_v43  ;;  %v826_v53 = vrot.slane %v1386_v48, 2  ;;  %v829_v56 = vrot.slane %v1388_v52, 2 }
  0x1b   : > { %1309 = vmatmul.mubr.msk.bf16.vlgmr.msra.gmra.mrb[4].mxu0 %vm268_vm1, %v458_v34  ;;  %v735_v54 = vsel %vm357_vm2, %v732_v43, %v734_v47 }
  0x1c   : > { %1319 = vmatpush3.bf16.msra.mxu0 %v648_v33  ;;  %1320 = vmatprep.mubr.msk.bf16.mxu0 %vm268_vm1, %v1381_v26  ;;  %v828_v55 = vsel %vm453_vm3, %v826_v53, %v827_v49  ;;  %v830_v57 = vsel %vm453_vm3, %v827_v49, %v829_v56 }
  0x1d   : > { %1352 = vmatprep.subr.msk.bf16.mxu0 %vm275_vm0, %v1253_v30 }
  0x1f   : > { %1315 = vmatmul.mubr.msk.bf16.vlgmr.msra.gmra.mrb[4].mxu1 %vm268_vm1, %v554_v40 }
  0x20   : > { %1325 = vmatpush3.bf16.msra.mxu1 %v743_v41  ;;  %1326 = vmatprep.mubr.msk.bf16.mxu1 %vm268_vm1, %v733_v50 }
  0x21   : > { %1336 = vmatprep.subr.mxu1 %v1405_v59 }
  0x23   : > { %1321 = vmatmul.mubr.msk.bf16.vlgmr.msra.gmra.mrb[8].mxu0 %vm268_vm1, %v1382_v45 }
  0x24   : > { %1331 = vmatpush3.bf16.msra.mxu0 %v838_v51  ;;  %1332 = vmatprep.mubr.msk.bf16.mxu0 %vm268_vm1, %v828_v55 }
  0x27   : > { %1327 = vmatmul.mubr.msk.bf16.vlgmr.msra.gmra.mrb[8].mxu1 %vm268_vm1, %v735_v54 }
  0x28   : > { %1337 = vmatpush3.msk.msra.mxu1 %vm275_vm0, %v931_v58  ;;  %1338 = vmatprep.mubr.msk.f32.mxu1 %vm1406_vm6, %v1405_v59 }
  0x29   : > { %1341 = vmatprep.subr.mxu1 %v1405_v59 }
  0x2b   : > { %1333 = vmatmul.mubr.msk.bf16.vlgmr.msra.gmra.mrb[12].mxu0 %vm268_vm1, %v830_v57 }
  0xe6   : > { %v1298_v60 = vpop.f32.mrb[0].mxu0 }
  0xe7   : > { %331 = vst.msk [vmem:[#allocation2 + $0x10] sm:$0xff] %vm328_vm5, %v1298_v60  ;;  %v313_v61 = vpop.f32.mrb[1].mxu0 }
  0xe8   : > { %329 = vst.msk [vmem:[#allocation2] sm:$0xff] %vm328_vm5, %v313_v61  ;;  %v1299_v62 = vpop.f32.mrb[2].mxu0 }
  0xe9   : > { %332 = vst.msk [vmem:[#allocation2 + $0x18] sm:$0xff] %vm328_vm5, %v1299_v62  ;;  %v316_v63 = vpop.f32.mrb[3].mxu0 }
  0xea   : > { %330 = vst.msk [vmem:[#allocation2 + $0x8] sm:$0xff] %vm328_vm5, %v316_v63  ;;  %v1304_v0 = vpop.f32.mrb[0].mxu1 }
  0xeb   : > { %v406_v1 = vpop.f32.mrb[1].mxu1 }
  0xec   : > { %v1305_v3 = vpop.f32.mrb[2].mxu1 }
  0xed   : > { %v409_v6 = vpop.f32.mrb[3].mxu1 }
  0xee   : > { %v340_v2 = vld [vmem:[#allocation2 + $0x10] sm:$0xff]  ;;  %v1310_v9 = vpop.f32.mrb[4].mxu0 }
  0xef   : > { %v423_v4 = vadd.f32 %v1304_v0, %v340_v2  ;;  %v338_v5 = vld [vmem:[#allocation2] sm:$0xff]  ;;  %v502_v12 = vpop.f32.mrb[5].mxu0 }
  0xf0   : > { %v421_v7 = vadd.f32 %v406_v1, %v338_v5  ;;  %v341_v8 = vld [vmem:[#allocation2 + $0x18] sm:$0xff]  ;;  %v1311_v14 = vpop.f32.mrb[6].mxu0 }
  0xf1   : > { %427 = vst.msk [vmem:[#allocation2 + $0x10] sm:$0xff] %vm328_vm5, %v423_v4  ;;  %v424_v10 = vadd.f32 %v1305_v3, %v341_v8  ;;  %v339_v11 = vld [vmem:[#allocation2 + $0x8] sm:$0xff]  ;;  %v505_v15 = vpop.f32.mrb[7].mxu0 }
  0xf2   : > { %425 = vst.msk [vmem:[#allocation2] sm:$0xff] %vm328_vm5, %v421_v7  ;;  %v422_v13 = vadd.f32 %v409_v6, %v339_v11  ;;  %v1316_v16 = vpop.f32.mrb[4].mxu1 }
  0xf3   : > { %428 = vst.msk [vmem:[#allocation2 + $0x18] sm:$0xff] %vm328_vm5, %v424_v10  ;;  %v598_v17 = vpop.f32.mrb[5].mxu1 }
  0xf4   : > { %426 = vst.msk [vmem:[#allocation2 + $0x8] sm:$0xff] %vm328_vm5, %v422_v13  ;;  %v1317_v18 = vpop.f32.mrb[6].mxu1 }
  0xf5   : > { %v601_v19 = vpop.f32.mrb[7].mxu1 }
  0xf6   : > { %v1322_v21 = vpop.f32.mrb[8].mxu0 }
  0xf7   : > { %v684_v24 = vpop.f32.mrb[9].mxu0 }
  0xf8   : > { %v436_v20 = vld [vmem:[#allocation2 + $0x10] sm:$0xff]  ;;  %v1323_v27 = vpop.f32.mrb[10].mxu0 }
  0xf9   : > { %v519_v22 = vadd.f32 %v1310_v9, %v436_v20  ;;  %v434_v23 = vld [vmem:[#allocation2] sm:$0xff]  ;;  %v687_v30 = vpop.f32.mrb[11].mxu0 }
  0xfa   : > { %v517_v25 = vadd.f32 %v502_v12, %v434_v23  ;;  %v437_v26 = vld [vmem:[#allocation2 + $0x18] sm:$0xff]  ;;  %v1328_v32 = vpop.f32.mrb[8].mxu1 }
  0xfb   : > { %523 = vst.msk [vmem:[#allocation2 + $0x10] sm:$0xff] %vm328_vm5, %v519_v22  ;;  %v520_v28 = vadd.f32 %v1311_v14, %v437_v26  ;;  %v435_v29 = vld [vmem:[#allocation2 + $0x8] sm:$0xff]  ;;  %v779_v33 = vpop.f32.mrb[9].mxu1 }
  0xfc   : > { %521 = vst.msk [vmem:[#allocation2] sm:$0xff] %vm328_vm5, %v517_v25  ;;  %v518_v31 = vadd.f32 %v505_v15, %v435_v29  ;;  %v1329_v34 = vpop.f32.mrb[10].mxu1 }
  0xfd   : > { %524 = vst.msk [vmem:[#allocation2 + $0x18] sm:$0xff] %vm328_vm5, %v520_v28  ;;  %v782_v35 = vpop.f32.mrb[11].mxu1 }
  0xfe   : > { %522 = vst.msk [vmem:[#allocation2 + $0x8] sm:$0xff] %vm328_vm5, %v518_v31  ;;  %v1334_v36 = vpop.f32.mrb[12].mxu0 }
  0xff   : > { %v874_v37 = vpop.f32.mrb[13].mxu0 }
 0x100   : > { %v1335_v39 = vpop.f32.mrb[14].mxu0 }
 0x101   : > { %v877_v42 = vpop.f32.mrb[15].mxu0 }
 0x102   : > { %v532_v38 = vld [vmem:[#allocation2 + $0x10] sm:$0xff] }
 0x103   : > { %v615_v40 = vadd.f32 %v1316_v16, %v532_v38  ;;  %v530_v41 = vld [vmem:[#allocation2] sm:$0xff] }
 0x104   : > { %v613_v43 = vadd.f32 %v598_v17, %v530_v41  ;;  %v533_v44 = vld [vmem:[#allocation2 + $0x18] sm:$0xff] }
 0x105   : > { %619 = vst.msk [vmem:[#allocation2 + $0x10] sm:$0xff] %vm328_vm5, %v615_v40  ;;  %v616_v45 = vadd.f32 %v1317_v18, %v533_v44  ;;  %v531_v46 = vld [vmem:[#allocation2 + $0x8] sm:$0xff] }
 0x106   : > { %617 = vst.msk [vmem:[#allocation2] sm:$0xff] %vm328_vm5, %v613_v43  ;;  %v614_v47 = vadd.f32 %v601_v19, %v531_v46 }
 0x107   : > { %620 = vst.msk [vmem:[#allocation2 + $0x18] sm:$0xff] %vm328_vm5, %v616_v45 }
 0x108   : > { %618 = vst.msk [vmem:[#allocation2 + $0x8] sm:$0xff] %vm328_vm5, %v614_v47 }
 0x10c   : > { %v627_v48 = vld [vmem:[#allocation2 + $0x10] sm:$0xff] }
 0x10d   : > { %v701_v49 = vadd.f32 %v1322_v21, %v627_v48  ;;  %v625_v50 = vld [vmem:[#allocation2] sm:$0xff] }
 0x10e   : > { %v699_v51 = vadd.f32 %v684_v24, %v625_v50  ;;  %v628_v52 = vld [vmem:[#allocation2 + $0x18] sm:$0xff] }
 0x10f   : > { %705 = vst.msk [vmem:[#allocation2 + $0x10] sm:$0xff] %vm328_vm5, %v701_v49  ;;  %v702_v53 = vadd.f32 %v1323_v27, %v628_v52  ;;  %v626_v54 = vld [vmem:[#allocation2 + $0x8] sm:$0xff] }
 0x110   : > { %703 = vst.msk [vmem:[#allocation2] sm:$0xff] %vm328_vm5, %v699_v51  ;;  %v700_v55 = vadd.f32 %v687_v30, %v626_v54 }
 0x111   : > { %706 = vst.msk [vmem:[#allocation2 + $0x18] sm:$0xff] %vm328_vm5, %v702_v53 }
 0x112   : > { %704 = vst.msk [vmem:[#allocation2 + $0x8] sm:$0xff] %vm328_vm5, %v700_v55 }
 0x116   : > { %v714_v56 = vld [vmem:[#allocation2 + $0x10] sm:$0xff] }
 0x117   : > { %v796_v57 = vadd.f32 %v1328_v32, %v714_v56  ;;  %v712_v58 = vld [vmem:[#allocation2] sm:$0xff] }
 0x118   : > { %v794_v60 = vadd.f32 %v779_v33, %v712_v58  ;;  %v715_v61 = vld [vmem:[#allocation2 + $0x18] sm:$0xff]  ;;  %v1017_v33 = vld [vmem:[%s1627_s4] sm:$0x3] }
 0x119   : > { %800 = vst.msk [vmem:[#allocation2 + $0x10] sm:$0xff] %vm328_vm5, %v796_v57  ;;  %v797_v62 = vadd.f32 %v1329_v34, %v715_v61  ;;  %v713_v63 = vld [vmem:[#allocation2 + $0x8] sm:$0xff]  ;;  %v1259_v34 = vld [vmem:[%s1626_s3] ss:$0 sm:$0xff] }
 0x11a   : > { %798 = vst.msk [vmem:[#allocation2] sm:$0xff] %vm328_vm5, %v794_v60  ;;  %v795_v0 = vadd.f32 %v782_v35, %v713_v63 }
 0x11b   : > { %801 = vst.msk [vmem:[#allocation2 + $0x18] sm:$0xff] %vm328_vm5, %v797_v62 }
 0x11c   : > { %799 = vst.msk [vmem:[#allocation2 + $0x8] sm:$0xff] %vm328_vm5, %v795_v0 }
 0x120   : > { %v809_v1 = vld [vmem:[#allocation2 + $0x10] sm:$0xff] }
 0x121   : > { %v891_v2 = vadd.f32 %v1334_v36, %v809_v1  ;;  %v807_v3 = vld [vmem:[#allocation2] sm:$0xff] }
 0x122   : > { %v889_v4 = vadd.f32 %v874_v37, %v807_v3  ;;  %v810_v5 = vld [vmem:[#allocation2 + $0x18] sm:$0xff] }
 0x123   : > { %895 = vst.msk [vmem:[#allocation2 + $0x10] sm:$0xff] %vm328_vm5, %v891_v2  ;;  %v892_v6 = vadd.f32 %v1335_v39, %v810_v5  ;;  %v808_v7 = vld [vmem:[#allocation2 + $0x8] sm:$0xff]  ;;  %v1262_v39 = vld [vmem:[%s1628_s5] ss:$0 sm:$0xff]  ;;  %v1145_v5 = vlaneseq }
 0x124   : > { %893 = vst.msk [vmem:[#allocation2] sm:$0xff] %vm328_vm5, %v889_v4  ;;  %v890_v8 = vadd.f32 %v877_v42, %v808_v7 }
 0x125   : > { %896 = vst.msk [vmem:[#allocation2 + $0x18] sm:$0xff] %vm328_vm5, %v892_v6  ;;  %v1146_v6 = vshrl.u32 %v1145_v5, 7 }
 0x126   : > { %894 = vst.msk [vmem:[#allocation2 + $0x8] sm:$0xff] %vm328_vm5, %v890_v8 }
 0x12a   : > { %v1580_v11 = vld [vmem:[#allocation2 + $0x10] sm:$0xff] }
 0x12b   : > { %v1576_v9 = vld [vmem:[#allocation2] sm:$0xff]  ;;  %v904_v16 = vsel %vm328_vm5, %v1580_v11, 0.0 }
 0x12c   : > { %v901_v12 = vsel %vm328_vm5, %v1576_v9, 0.0  ;;  %v1586_v14 = vld [vmem:[#allocation2 + $0x18] sm:$0xff] }
 0x12d   : > { %v1578_v10 = vld [vmem:[#allocation2 + $0x8] sm:$0xff]  ;;  %v906_v18 = vsel %vm328_vm5, %v1586_v14, 0.0 }
 0x12e   : > { %v902_v13 = vsel %vm328_vm5, %v1578_v10, 0.0 }
 0x12f   : > { %v903_v15 = vadd.f32 %v902_v13, %v901_v12  ;;  %v1147_v13 = vsub.s32 0, %v1146_v6 }
 0x131   : > { %v905_v17 = vadd.f32 %v904_v16, %v903_v15 }
 0x133   : > { %v907_v19 = vadd.f32 %v906_v18, %v905_v17 }
 0x135   : > { %v908_v20 = vrot.slane %v907_v19, 4 }
 0x137   : > { %v909_v21 = vadd.f32 %v908_v20, %v907_v19 }
 0x139   : > { %v910_v22 = vrot.slane %v909_v21, 2 }
 0x13b   : > { %v911_v23 = vadd.f32 %v910_v22, %v909_v21 }
 0x13d   : > { %v912_v24 = vrot.slane %v911_v23, 1 }
 0x13f   : > { %v913_v25 = vadd.f32 %v912_v24, %v911_v23 }
 0x141   : > { %v914_v26 = vmul.f32 0.03125, %v913_v25 }
 0x143   : > { %922 = vrot.lane.b32.xlu1 %v914_v26, %s1407_s19  ;;  %916 = vrot.lane.b32.xlu0 %v914_v26, %s1408_s20 }
 0x147   : > { %919 = vrot.lane.b32.xlu0 %v914_v26, %s1409_s23 }
 0x1b5   : > { %v917_v27 = vpop.permute.xlu0 %916  ;;  %v923_v30 = vpop.permute.xlu1 %922 }
 0x1b6   : > { %v926_v28 = vsel %vm925_vm7, %v914_v26, %v917_v27 }
 0x1b9   : > { %v920_v29 = vpop.permute.xlu0 %919 }
 0x1ba   : > { %v928_v31 = vsel %vm927_vm8, %v926_v28, %v920_v29 }
 0x1bb   : > { %v930_v32 = vsel %vm929_vm9, %v928_v31, %v923_v30 }
 0x1bc   : > { %1339 = vmatmul.mubr.msk.f32.vlgmr.msra.gmra.mrb[12].mxu1 %vm939_vm10, %v930_v32 }
 0x1bd   : > { %1343 = vmatprep.mubr.msk.f32.mxu1 %vm1406_vm6, %v1405_v59  ;;  %1342 = vmatpush3.msk.msra.mxu1 %vm927_vm8, %v1017_v33 }
 0x28f   : > { %v1012_v35 = vpop.f32.mrb[12].mxu1 }
 0x290   : > { %v1013_v36 = vadd.f32 %v1259_v34, %v1012_v35  ;;  %v1340_v37 = vpop.f32.mrb[13].mxu1 }
 0x292   : > { %v1016_v38 = vmax.f32 %v1013_v36, 0.0 }
 0x294   : > { %1344 = vmatmul.mubr.msk.f32.vlgmr.msra.gmra.mrb[14].mxu1 %vm1025_vm11, %v1016_v38 }
 0x367   : > { %v1098_v59 = vpop.f32.mrb[14].mxu1 }
 0x368   : > { %v1099_v40 = vadd.f32 %v1262_v39, %v1098_v59  ;;  %v1345_v41 = vpop.f32.mrb[15].mxu1 }
 0x36a   : > { %v1265_v42 = vmul.f32 -1.442695, %v1099_v40 }
 0x36c   : > { %1389 = vpow2.f32 %v1265_v42 }
 0x376   : > { %v1390_v43 = vpop.eup %1389 }
 0x377   : > { %v1105_v44 = vadd.f32 1.0, %v1390_v43 }
 0x379   : > { %1391 = vrcp.f32 %v1105_v44 }
 0x383   : > { %v1392_v45 = vpop.eup %1391 }
 0x384   : > { %v1109_v46 = vsel %vm1108_vm12, %v1392_v45, -inf }
 0x385   : > { %v1110_v47 = vrot.slane %v1109_v46, 4 }
 0x387   : > { %v1111_v48 = vmax.f32 %v1109_v46, %v1110_v47 }
 0x389   : > { %v1112_v49 = vrot.slane %v1111_v48, 2 }
 0x38b   : > { %v1113_v50 = vmax.f32 %v1111_v48, %v1112_v49 }
 0x38d   : > { %v1114_v51 = vrot.slane %v1113_v50, 1 }
 0x38f   : > { %v1115_v52 = vmax.f32 %v1113_v50, %v1114_v51 }
 0x391   : > { %v1116_v53 = vsub.f32 %v1392_v45, %v1115_v52 }
 0x393   : > { %v1117_v54 = vmul.f32 1.442695, %v1116_v53 }
 0x395   : > { %1393 = vpow2.f32 %v1117_v54 }
 0x39f   : > { %v1394_v55 = vpop.eup %1393 }
 0x3a0   : > { %v1119_v56 = vsel %vm1108_vm12, %v1394_v55, 0.0 }
 0x3a1   : > { %v1120_v57 = vrot.slane %v1119_v56, 4 }
 0x3a3   : > { %v1121_v58 = vadd.f32 %v1120_v57, %v1119_v56 }
 0x3a5   : > { %v1122_v60 = vrot.slane %v1121_v58, 2 }
 0x3a7   : > { %v1123_v61 = vadd.f32 %v1122_v60, %v1121_v58 }
 0x3a9   : > { %v1124_v62 = vrot.slane %v1123_v61, 1 }
 0x3ab   : > { %v1125_v63 = vadd.f32 %v1124_v62, %v1123_v61 }
 0x3ad   : > { %1395 = vrcp.f32 %v1125_v63 }
 0x3b7   : > { %v1396_v0 = vpop.eup %1395 }
 0x3b8   : > { %v1127_v1 = vmul.f32 %v1396_v0, %v1394_v55 }
 0x3ba   : > { %v1133_v2 = vrot.slane %v1127_v1, 2  ;;  %v1129_v3 = vrot.slane %v1127_v1, 1  ;;  %v1137_v4 = vrot.slane %v1127_v1, 3 }
 0x3bc   : > { %1134 = vrot.lane.b32.xlu0 %v1133_v2, %s1410_s30  ;;  %1130 = vrot.lane.b32.xlu1 %v1129_v3, %s1411_s7 }
 0x3c0   : > { %1138 = vrot.lane.b32.xlu1 %v1137_v4, %s1412_s8 }
 0x42e   : > { %v1131_v7 = vpop.permute.xlu1 %1130  ;;  %v1135_v8 = vpop.permute.xlu0 %1134 }
 0x42f   : > { %v1141_v12 = vsel %vm939_vm10, %v1127_v1, %v1131_v7 }
 0x430   : > { %v1142_v15 = vsel %vm268_vm1, %v1141_v12, %v1135_v8 }
 0x432   : > { %v1139_v16 = vpop.permute.xlu1 %1138 }
 0x433   : > { %v1144_v17 = vsel %vm1143_vm13, %v1142_v15, %v1139_v16 }
 0x434   : > { %v1148_v18 = vrot.slane %v1144_v17, %v1147_v13 }
 0x436   : > { %v1149_v19 = vmul.f32 %v1148_v18, %v1576_v9  ;;  %v1150_v20 = vmul.f32 %v1148_v18, %v1578_v10  ;;  %v1151_v21 = vmul.f32 %v1148_v18, %v1580_v11  ;;  %v1152_v22 = vmul.f32 %v1148_v18, %v1586_v14 }
 0x438   : > { %1153 = vst.msk [vmem:[%s251_s12] sm:$0xff] %vm328_vm5, %v1149_v19  ;;  %1154 = vst.msk [vmem:[%s251_s12 + $0x8] sm:$0xff] %vm328_vm5, %v1150_v20 }
 0x439   : > { %1155 = vst.msk [vmem:[%s251_s12 + $0x10] sm:$0xff] %vm328_vm5, %v1151_v21  ;;  %1156 = vst.msk [vmem:[%s251_s12 + $0x18] sm:$0xff] %vm328_vm5, %v1152_v22 }
 0x43a PF: > { %s16_s21 = sadd.s32 1, %s1403_s21  }
 0x43b   : > { %p13_p4 = scmp.ge.s32.totalorder %s16_s21, 4  }
 0x43d   :  { %15 = sbr.rel (!%p13_p4) target bundleno = 1 (0x1), region = 80 }

</bundles_post_ra>
